<compile_context>
chip_gen: v5e
topology: v5e:2x2
jax: 0.10.0
libtpu: 0.0.40
codegen_flags: <defaults>
</compile_context>

<pallas_src>
import jax
import jax.numpy as jnp
from jax.experimental import pallas as pl
from jax.experimental.pallas import tpu as pltpu


def _stacked_features_kernel(x_ref, w_ref, b_ref, o_ref):
    # One MXU matmul per batch tile (f32 accumulation) + broadcast bias add.
    acc = jnp.dot(x_ref[...], w_ref[...], preferred_element_type=jnp.float32)
    o_ref[...] = (acc + b_ref[...]).astype(o_ref.dtype)


def _round_up(x, m):
    return ((x + m - 1) // m) * m


def _sublane(dtype):
    # Packed-tile sublane minimum: 8 for 4-byte, 16 for 2-byte, 32 for 1-byte.
    return max(8, 32 // jnp.dtype(dtype).itemsize)


# Streamed-tile + resident-weight VMEM budget, conservative across generations
# (v5e/v6e: 128 MiB physical, v7x: only 64 MiB physical).
_VMEM_TARGET_BYTES = 48 * 1024 * 1024


def _stacked_features_matmul(x, w_flat, bias_flat, out_dtype, *, tm=None):
    """x: (B_flat, dim_in); w_flat: (dim_in, N); bias_flat: (1, N) f32."""
    b_flat, dim_in = x.shape
    n = w_flat.shape[1]

    x_item = jnp.dtype(x.dtype).itemsize
    w_item = jnp.dtype(w_flat.dtype).itemsize
    b_item = jnp.dtype(bias_flat.dtype).itemsize
    o_item = jnp.dtype(out_dtype).itemsize

    # Sublane multiple must satisfy both the x-tile and the out-tile dtypes.
    sub = max(_sublane(x.dtype), _sublane(out_dtype))

    # Resident weight + bias: Pallas double-buffers inputs by default even with
    # a constant index_map, so count them twice.
    resident_bytes = 2 * (dim_in * n * w_item + n * b_item)
    per_row_bytes = dim_in * x_item + n * o_item  # one double-buffered x+out row

    budget = max(0, _VMEM_TARGET_BYTES - resident_bytes)
    tm_max = max(sub, (budget // (2 * per_row_bytes)) // sub * sub)

    if tm is None:
        tm = min(1024, tm_max)
        # v7x: guarantee >= 2 grid steps on moderate/large batches so the
        # "parallel" axis actually uses both TensorCores.
        if b_flat > 512:
            tm = min(tm, _round_up(pl.cdiv(b_flat, 2), sub))
    else:
        tm = min(_round_up(max(tm, 1), sub), tm_max)
    # Never allocate tiles larger than the (sublane-rounded) batch itself.
    tm = max(sub, min(tm, _round_up(b_flat, sub)))

    grid_m = pl.cdiv(b_flat, tm)

    # Explicit VMEM limit: double-buffered streamed tiles + resident weight/bias
    # + slack for compiler-internal scratch.  Needed on v5e (16 MiB default
    # scoped VMEM) and keeps us honest on v7x (64 MiB physical).
    vmem_needed = 2 * tm * per_row_bytes + resident_bytes
    vmem_limit = int(min(64 << 20, max(vmem_needed + (4 << 20), 16 << 20)))

    cost = pl.CostEstimate(
        flops=2 * b_flat * dim_in * n,
        transcendentals=0,
        bytes_accessed=(x.size * x_item + w_flat.size * w_item
                        + bias_flat.size * b_item + b_flat * n * o_item),
    )

    return pl.pallas_call(
        _stacked_features_kernel,
        out_shape=jax.ShapeDtypeStruct((b_flat, n), out_dtype),
        grid_spec=pltpu.PrefetchScalarGridSpec(
            num_scalar_prefetch=0,
            grid=(grid_m,),
            in_specs=[
                # Streamed, double-buffered batch tiles of x.
                pl.BlockSpec((tm, dim_in), lambda i: (i, 0)),
                # Weight & bias: constant index_map -> fetched once, VMEM-resident.
                pl.BlockSpec((dim_in, n), lambda i: (0, 0)),
                pl.BlockSpec((1, n), lambda i: (0, 0)),
            ],
            # Full-array last dim (N) is legal even when N % 128 != 0; the
            # masked store is cheaper than padding + a separate de-pad pass.
            out_specs=pl.BlockSpec((tm, n), lambda i: (i, 0)),
        ),
        compiler_params=pltpu.CompilerParams(
            dimension_semantics=("parallel",),
            vmem_limit_bytes=vmem_limit,
        ),
        cost_estimate=cost,
    )(x, w_flat, bias_flat)


class ToStackedFeatures:
    """JAX/Pallas port of the PyTorch ToStackedFeatures module.

    Weight/bias flattening (and the optional bf16 cast) happen once here, not
    per call, so each forward only streams x and the already-prepared weight.
    """

    def __init__(self, weight, bias, *, compute_dtype=None):
        dim_in, num_stack, dim_out = weight.shape
        self.dim_in = dim_in
        self.num_stack = num_stack
        self.dim_out = dim_out
        self.n = num_stack * dim_out
        self.compute_dtype = compute_dtype

        w_flat = jnp.asarray(weight).reshape(dim_in, self.n)
        if compute_dtype is not None:
            w_flat = w_flat.astype(compute_dtype)
        self.w_flat = w_flat
        # Bias is added post-accumulation; keep it f32 for accuracy (it's tiny).
        self.bias_flat = jnp.asarray(bias).reshape(1, self.n).astype(jnp.float32)

    def __call__(self, feature, *, tm=None):
        no_batch = feature.ndim == 1
        if no_batch:
            feature = feature[None, :]
        batch_shape = feature.shape[:-1]
        out_dtype = feature.dtype

        x = feature.reshape(-1, self.dim_in)
        if self.compute_dtype is not None:
            x = x.astype(self.compute_dtype)

        out_flat = _stacked_features_matmul(
            x, self.w_flat, self.bias_flat, out_dtype, tm=tm)

        out = out_flat.reshape(*batch_shape, self.num_stack, self.dim_out)
        if no_batch:
            out = out[0]
        return out


if __name__ == "__main__":
    dim_in, dim_out, num_stack = 32, 16, 4

    key = jax.random.PRNGKey(0)
    k_w, k_b, k_x, k_x2 = jax.random.split(key, 4)

    scale = dim_out ** (-0.5)
    weight = jax.random.normal(k_w, (dim_in, num_stack, dim_out), jnp.float32) * scale
    bias = jax.random.normal(k_b, (num_stack, dim_out), jnp.float32) * scale

    # Exact-parity (f32) module; weight prep happens once here.
    module = ToStackedFeatures(weight, bias)

    # Small 2-D batch case.
    x = jax.random.normal(k_x, (2, 4, dim_in), jnp.float32)
    out = jax.block_until_ready(module(x))
    ref = jnp.einsum('...i,isj->...sj', x, weight) + bias
    assert out.shape == (2, 4, num_stack, dim_out), out.shape
    assert jnp.allclose(out, ref, atol=1e-5, rtol=1e-5), \
        float(jnp.max(jnp.abs(out - ref)))

    # Larger batch exercising multiple grid tiles + a partial tail tile.
    x2 = jax.random.normal(k_x2, (3, 100, dim_in), jnp.float32)  # B_flat=300
    out2 = jax.block_until_ready(module(x2, tm=128))             # 3 tiles, tail=44
    ref2 = jnp.einsum('...i,isj->...sj', x2, weight) + bias
    assert out2.shape == (3, 100, num_stack, dim_out), out2.shape
    assert jnp.allclose(out2, ref2, atol=1e-5, rtol=1e-5), \
        float(jnp.max(jnp.abs(out2 - ref2)))

    # No-batch (1-D input) case.
    x1 = x[0, 0]
    out1 = jax.block_until_ready(module(x1))
    ref1 = jnp.einsum('i,isj->sj', x1, weight) + bias
    assert out1.shape == (num_stack, dim_out), out1.shape
    assert jnp.allclose(out1, ref1, atol=1e-5, rtol=1e-5)

    # Accuracy-gated bf16 compute path (halves streamed/resident bytes;
    # still f32 accumulation and f32 output).
    module_bf16 = ToStackedFeatures(weight, bias, compute_dtype=jnp.bfloat16)
    out_bf = jax.block_until_ready(module_bf16(x2))
    assert out_bf.shape == ref2.shape and out_bf.dtype == ref2.dtype
    assert jnp.allclose(out_bf, ref2, atol=1e-1, rtol=1e-1), \
        float(jnp.max(jnp.abs(out_bf - ref2)))

    print("KERNEL_OK")
</pallas_src>

<mosaic_0001>
module attributes {stable_mosaic.version = 11 : i64} {
  func.func @_stacked_features_kernel(%arg0: i32, %arg1: memref<8x32xf32, #tpu.memory_space<vmem>>, %arg2: memref<32x64xf32, #tpu.memory_space<vmem>>, %arg3: memref<1x64xf32, #tpu.memory_space<vmem>>, %arg4: memref<8x64xf32, #tpu.memory_space<vmem>>) attributes {dimension_semantics = [#tpu.dimension_semantics<parallel>], iteration_bounds = array<i64: 1>, scalar_prefetch = 0 : i64, scratch_operands = 0 : i64, tpu.core_type = #tpu.core_type<tc>, window_params = [{transform_indices = @transform_0, window_bounds = array<i64: 8, 32>}, {pipeline_mode = #tpu.pipeline_mode<synchronous>, transform_indices = @transform_1, window_bounds = array<i64: 32, 64>}, {pipeline_mode = #tpu.pipeline_mode<synchronous>, transform_indices = @transform_2, window_bounds = array<i64: 1, 64>}, {transform_indices = @transform_3, window_bounds = array<i64: 8, 64>}]} {
    %c0 = arith.constant 0 : index
    %c0_0 = arith.constant 0 : index
    %0 = vector.load %arg1[%c0, %c0_0] : memref<8x32xf32, #tpu.memory_space<vmem>>, vector<8x32xf32>
    %c0_1 = arith.constant 0 : index
    %c0_2 = arith.constant 0 : index
    %1 = vector.load %arg2[%c0_1, %c0_2] : memref<32x64xf32, #tpu.memory_space<vmem>>, vector<32x64xf32>
    %cst = arith.constant dense<0.000000e+00> : vector<8x64xf32>
    %2 = tpu.matmul %0, %1, %cst {dimension_numbers = #tpu.dot_dimension_numbers<[1], [0], [0], [1], [0, 0, 1, 1], [], []>} : vector<8x32xf32>, vector<32x64xf32>, vector<8x64xf32> -> vector<8x64xf32>
    %c0_3 = arith.constant 0 : index
    %c0_4 = arith.constant 0 : index
    %3 = vector.load %arg3[%c0_3, %c0_4] : memref<1x64xf32, #tpu.memory_space<vmem>>, vector<1x64xf32>
    %4 = vector.broadcast %3 : vector<1x64xf32> to vector<8x64xf32>
    %5 = arith.addf %2, %4 : vector<8x64xf32>
    %c0_5 = arith.constant 0 : index
    %c0_6 = arith.constant 0 : index
    %6 = vector.load %arg4[%c0_5, %c0_6] : memref<8x64xf32, #tpu.memory_space<vmem>>, vector<8x64xf32>
    tpu.vector_store %arg4[%c0_5, %c0_6], %5 {strides = array<i32>} : memref<8x64xf32, #tpu.memory_space<vmem>>, vector<8x64xf32>,
    return
  }
  func.func @transform_0(%arg0: i32) -> (i32, i32) {
    %c0_i32 = arith.constant 0 : i32
    %c0_i32_0 = arith.constant 0 : i32
    return %arg0, %c0_i32 : i32, i32
  }
  func.func @transform_1(%arg0: i32) -> (i32, i32) {
    %c0_i32 = arith.constant 0 : i32
    %c0_i32_0 = arith.constant 0 : i32
    %c0_i32_1 = arith.constant 0 : i32
    return %c0_i32, %c0_i32_0 : i32, i32
  }
  func.func @transform_2(%arg0: i32) -> (i32, i32) {
    %c0_i32 = arith.constant 0 : i32
    %c0_i32_0 = arith.constant 0 : i32
    %c0_i32_1 = arith.constant 0 : i32
    return %c0_i32, %c0_i32_0 : i32, i32
  }
  func.func @transform_3(%arg0: i32) -> (i32, i32) {
    %c0_i32 = arith.constant 0 : i32
    %c0_i32_0 = arith.constant 0 : i32
    return %arg0, %c0_i32 : i32, i32
  }
}

</mosaic_0001>

<bundles_post_ra>
// kernel: tpu_custom_call.1
= control target key start
LH: loop header
LB: loop body
LE: loop exit
PB: predicated region body
PF: predicated region fallthrough
CT: control target
= control target key end

     0   :  { %8 = vsyncpa [#allocation3], 0  ;;  %s220_s0 = inlined_call_operand.hbm [shape: f32[8,32], index: 0, kind: input, shape index: {}]   ;;  %s221_s1 = inlined_call_operand.hbm [shape: f32[32,64], index: 1, kind: input, shape index: {}]   ;;  %s222_s2 = inlined_call_operand.vmem [shape: f32[1,64], index: 2, kind: input, shape index: {}]   ;;  %s223_s3 = inlined_call_operand.hbm [shape: f32[8,64], index: 3, kind: output, shape index: {}]  }
   0x1   :  { %9 = vsyncpa [#allocation6], 0 }
   0x2   :  { %10 = vsyncpa [#allocation4], 0  ;;  %s16_s14 = sshll.u32 %s220_s0, 4  ;;  %s183_s15 = smov [#allocation2]   ;;  %s17_s14 = int_to_ptr.hbm [resolvable:$true] %s16_s14 }
   0x3   :  { %s18_s16 = sshll.u32 %s183_s15, 4  ;;  %s26_s19 = sshll.u32 %s221_s1, 4  ;;  %s19_s16 = int_to_ptr.vmem [resolvable:$true] %s18_s16  ;;  %s27_s19 = int_to_ptr.hbm [resolvable:$true] %s26_s19 }
   0x4   :  { %21 = dma.hbm_to_vmem [thread:$0]  %s17_s14, 128, %s19_s16, [#allocation3]  }
   0x5   :  { %s184_s20 = smov [#allocation5]   ;;  %s185_s22 = smov 128  }
   0x6   :  { %s28_s21 = sshll.u32 %s184_s20, 4  ;;  %s186_s23 = smov 8   ;;  %s29_s21 = int_to_ptr.vmem [resolvable:$true] %s28_s21 }
   0x7   :  { %34 = dma.hbm_to_vmem [thread:$0]  %s27_s19, 512, %s29_s21, [#allocation6], %s185_s22, %s185_s22, %s186_s23  }
   0x8   :  { %177 = dma.done.wait [#allocation3], 128  }
   0x9   :  { %178 = vsyncadd [#allocation3], 4294967168 }
   0xa   :  { %179 = dma.done.wait [#allocation6], 512  }
   0xb   :  { %180 = vsyncadd [#allocation6], 4294966784  ;;  %v49_v0 = vld [vmem:[#allocation5 + $0x18] sm:$0xff]  ;;  %v48_v1 = vld [vmem:[#allocation5 + $0x10] sm:$0xff]  ;;  %vm54_vm0 = vcmask 261120   ;;  %s187_s24 = smov [#allocation7]  }
   0xc   :  { %70 = vmatpush.msra.mxu0 %v49_v0  ;;  %v47_v2 = vld [vmem:[#allocation5 + $0x8] sm:$0xff]  ;;  %v46_v3 = vld [vmem:[#allocation5] sm:$0xff]  ;;  %v45_v4 = vld [vmem:[#allocation2] sm:$0xff]  ;;  %s85_s25 = sshll.u32 %s187_s24, 4  ;;  %s87_s28 = sshll.u32 %s223_s3, 4  ;;  %vm78_vm1 = vcmask 523264   ;;  %s86_s25 = int_to_ptr.vmem [resolvable:$true] %s85_s25  ;;  %s88_s28 = int_to_ptr.hbm [resolvable:$true] %s87_s28 }
   0xd   :  { %v104_v5 = vld [vmem:[%s222_s2] ss:$0 sm:$0xff] }
   0xe   :  { %71 = vmatpush.msra.mxu0 %v48_v1 }
  0x10   :  { %72 = vmatpush.msra.mxu0 %v47_v2 }
  0x12   :  { %73 = vmatpush.msra.mxu0 %v46_v3 }
  0x13   :  { %98 = vmatmul.msk.f32.vlgmr.msra.gmra.mxu0 %vm54_vm0, %v45_v4 }
  0x90   :  { %v75_v6 = vpop.f32.mrf.mxu0 }
  0x91   :  { %v76_v7 = vadd.f32 %v104_v5, %v75_v6 }
  0x93   :  { %79 = vst.msk [vmem:[#allocation7] sm:$0xff] %vm78_vm1, %v76_v7 }
  0x94   :  { %90 = dma.vmem_to_hbm [thread:$0]  %s86_s25, 128, %s88_s28, [#allocation4]  }
  0x95   :  { %181 = dma.done.wait [#allocation4], 128  }
  0x96   :  { %182 = vsyncadd [#allocation4], 4294967168 }
  0x97   :  { %95 = vsyncpa [#allocation3], 1 }
  0x98   :  { %96 = vsyncpa [#allocation6], 1 }
  0x99   :  { %97 = vsyncpa [#allocation4], 1 }

</bundles_post_ra>
